<compile_context>
chip_gen: v7x
topology: tpu7x:2x2x1
jax: 0.10.0
libtpu: 0.0.40
codegen_flags: <defaults>
</compile_context>

<pallas_src>
import math
import functools

import jax
import jax.numpy as jnp
from jax.experimental import pallas as pl
from jax.experimental.pallas import tpu as pltpu


_VMEM_LIMIT_BYTES = 48 * 1024 * 1024  # raise scoped VMEM above 16/32 MiB defaults


# ---------------------------------------------------------------------------
# Kernel 1: fused Q/K/V projections, row-tiled over flattened (B*S, D).
# ---------------------------------------------------------------------------
def _qkv_proj_kernel(x_ref, wq_ref, bq_ref, wk_ref, bk_ref, wv_ref, bv_ref,
                     q_ref, k_ref, v_ref, *, compute_dtype):
    x = x_ref[...].astype(compute_dtype)
    q = jnp.dot(x, wq_ref[...], preferred_element_type=jnp.float32) + bq_ref[...]
    k = jnp.dot(x, wk_ref[...], preferred_element_type=jnp.float32) + bk_ref[...]
    v = jnp.dot(x, wv_ref[...], preferred_element_type=jnp.float32) + bv_ref[...]
    q_ref[...] = q.astype(q_ref.dtype)
    k_ref[...] = k.astype(k_ref.dtype)
    v_ref[...] = v.astype(v_ref.dtype)


# ---------------------------------------------------------------------------
# Kernel 2: flash attention (online softmax over kv tiles) + output projection
#           folded over heads + residual + LayerNorm (ln_slf).
# Grid: (B, S // TQ, S // TK), kv axis innermost & "arbitrary".
# The 1/sqrt(d_k) scaling is already folded into the Q projection weights.
# ---------------------------------------------------------------------------
def _flash_attn_ln_kernel(q_ref, k_ref, v_ref, x_ref, wo_ref, bo_ref,
                          g1_ref, b1_ref, o_ref,
                          m_s, l_s, acc_s,
                          *, numheads, eps, compute_dtype):
    ki = pl.program_id(2)

    @pl.when(ki == 0)
    def _():
        m_s[...] = jnp.full(m_s.shape, -jnp.inf, jnp.float32)
        l_s[...] = jnp.zeros(l_s.shape, jnp.float32)
        acc_s[...] = jnp.zeros(acc_s.shape, jnp.float32)

    qh = q_ref[0]          # (H, TQ, d_k)  compute dtype (pre-scaled)
    kh = k_ref[0]          # (H, TK, d_k)
    vh = v_ref[0]          # (H, TK, d_v)

    # Batched over heads; contracts last dims of both operands (no transpose).
    s = jnp.einsum('hqd,hkd->hqk', qh, kh,
                   preferred_element_type=jnp.float32)         # (H, TQ, TK) f32

    m_prev = m_s[...]
    m_new = jnp.maximum(m_prev, jnp.max(s, axis=-1, keepdims=True))
    alpha = jnp.exp(m_prev - m_new)
    p = jnp.exp(s - m_new)
    l_s[...] = alpha * l_s[...] + jnp.sum(p, axis=-1, keepdims=True)
    acc_s[...] = alpha * acc_s[...] + jnp.einsum(
        'hqk,hkd->hqd', p.astype(compute_dtype), vh,
        preferred_element_type=jnp.float32)
    m_s[...] = m_new

    @pl.when(ki == pl.num_programs(2) - 1)
    def _():
        inv_l = pl.reciprocal(l_s[...], approx=True)            # (H, TQ, 1)
        o_heads = (acc_s[...] * inv_l).astype(compute_dtype)    # (H, TQ, d_v)
        tq = o_heads.shape[1]
        d_model = wo_ref.shape[2]
        # Output projection folded into a per-head sum -> no concat / lane
        # slicing (H is small; loop is unrolled at trace time, MXU-bound).
        attn = jnp.zeros((tq, d_model), jnp.float32)
        for h in range(numheads):
            attn = attn + jnp.dot(o_heads[h], wo_ref[h],
                                  preferred_element_type=jnp.float32)
        attn = attn + bo_ref[...]

        # residual + LayerNorm (ln_slf), in f32
        x = x_ref[0].astype(jnp.float32)
        y = x + attn
        mu = jnp.mean(y, axis=-1, keepdims=True)
        var = jnp.mean((y - mu) ** 2, axis=-1, keepdims=True)
        n = (y - mu) * jax.lax.rsqrt(var + eps) * g1_ref[...] + b1_ref[...]
        o_ref[0] = n.astype(o_ref.dtype)


# ---------------------------------------------------------------------------
# Kernel 3: position-wise FFN with dff blocked on an "arbitrary" grid axis and
#           an f32 VMEM accumulator, fused residual + LayerNorm (ln_ff).
# Grid: (R // TR, dff // TF), dff axis innermost & "arbitrary".
# ---------------------------------------------------------------------------
def _ffn_ln_kernel(n_ref, wa_ref, ba_ref, wb_ref, bb_ref, g2_ref, b2_ref,
                   o_ref, acc_s, *, eps, compute_dtype):
    fi = pl.program_id(1)

    @pl.when(fi == 0)
    def _():
        acc_s[...] = jnp.zeros(acc_s.shape, jnp.float32)

    n = n_ref[...].astype(jnp.float32)
    h = jnp.dot(n.astype(compute_dtype), wa_ref[...],
                preferred_element_type=jnp.float32) + ba_ref[...]
    h = jnp.maximum(h, 0.0)   # ReLU per dff column -> valid under dff blocking
    acc_s[...] += jnp.dot(h.astype(compute_dtype), wb_ref[...],
                          preferred_element_type=jnp.float32)

    @pl.when(fi == pl.num_programs(1) - 1)
    def _():
        z = n + acc_s[...] + bb_ref[...]
        mu = jnp.mean(z, axis=-1, keepdims=True)
        var = jnp.mean((z - mu) ** 2, axis=-1, keepdims=True)
        out = (z - mu) * jax.lax.rsqrt(var + eps) * g2_ref[...] + b2_ref[...]
        o_ref[...] = out.astype(o_ref.dtype)


def _default_block(total, target):
    return target if total % target == 0 else total


def transformer_encoder_block(x, params, *, numheads, scale=True, eps=1e-5,
                              compute_dtype=jnp.bfloat16,
                              q_block=None, kv_block=None,
                              row_block=None, ff_block=None):
    """Forward pass of TransformerEncoderBlock (bidir, no mask, no dropout)."""
    B, S, D = x.shape
    Dk = params["wq"].shape[1]
    Dv = params["wv"].shape[1]
    d_k = Dk // numheads
    d_v = Dv // numheads
    dff = params["wa"].shape[1]
    R = B * S

    TQ = q_block or _default_block(S, 128)
    TK = kv_block or _default_block(S, 512)
    TR = row_block or _default_block(R, 256)
    TF = ff_block or _default_block(dff, 512)
    assert S % TQ == 0 and S % TK == 0 and R % TR == 0 and dff % TF == 0

    cd = compute_dtype
    # Fold the 1/sqrt(d_k) attention scaling into the Q projection (exact,
    # done in f32 before casting) -> no per-tile score scaling in kernel 2.
    inv_sqrt_dk = (1.0 / math.sqrt(d_k)) if scale else 1.0
    wq = (params["wq"] * inv_sqrt_dk).astype(cd)
    bq = params["bq"] * inv_sqrt_dk
    wk = params["wk"].astype(cd)
    wv = params["wv"].astype(cd)
    wo3 = params["wo"].reshape(numheads, d_v, D).astype(cd)   # (H, d_v, D)
    wa = params["wa"].astype(cd)
    wb = params["wb"].astype(cd)

    cp = lambda sem: pltpu.CompilerParams(
        dimension_semantics=sem, vmem_limit_bytes=_VMEM_LIMIT_BYTES)

    # ---- Kernel 1: QKV projection (row-tiled, lane-dense outputs) -----------
    x2 = x.reshape(R, D)
    q2, k2, v2 = pl.pallas_call(
        functools.partial(_qkv_proj_kernel, compute_dtype=cd),
        out_shape=(jax.ShapeDtypeStruct((R, Dk), cd),
                   jax.ShapeDtypeStruct((R, Dk), cd),
                   jax.ShapeDtypeStruct((R, Dv), cd)),
        grid_spec=pltpu.PrefetchScalarGridSpec(
            num_scalar_prefetch=0,
            grid=(R // TR,),
            in_specs=[
                pl.BlockSpec((TR, D), lambda r: (r, 0)),
                pl.BlockSpec((D, Dk), lambda r: (0, 0)),
                pl.BlockSpec((1, Dk), lambda r: (0, 0)),
                pl.BlockSpec((D, Dk), lambda r: (0, 0)),
                pl.BlockSpec((1, Dk), lambda r: (0, 0)),
                pl.BlockSpec((D, Dv), lambda r: (0, 0)),
                pl.BlockSpec((1, Dv), lambda r: (0, 0)),
            ],
            out_specs=(pl.BlockSpec((TR, Dk), lambda r: (r, 0)),
                       pl.BlockSpec((TR, Dk), lambda r: (r, 0)),
                       pl.BlockSpec((TR, Dv), lambda r: (r, 0)))),
        compiler_params=cp(("parallel",)),
    )(x2, wq, bq, wk, params["bk"], wv, params["bv"])

    # Host-side layout plumbing (XLA): split heads onto a leading axis.
    q4 = q2.reshape(B, S, numheads, d_k).transpose(0, 2, 1, 3)   # (B,H,S,dk)
    k4 = k2.reshape(B, S, numheads, d_k).transpose(0, 2, 1, 3)
    v4 = v2.reshape(B, S, numheads, d_v).transpose(0, 2, 1, 3)

    # ---- Kernel 2: flash attention + out-proj + residual + LN1 --------------
    n = pl.pallas_call(
        functools.partial(_flash_attn_ln_kernel, numheads=numheads,
                          eps=eps, compute_dtype=cd),
        out_shape=jax.ShapeDtypeStruct((B, S, D), x.dtype),
        grid_spec=pltpu.PrefetchScalarGridSpec(
            num_scalar_prefetch=0,
            grid=(B, S // TQ, S // TK),
            in_specs=[
                pl.BlockSpec((1, numheads, TQ, d_k), lambda b, qi, ki: (b, 0, qi, 0)),
                pl.BlockSpec((1, numheads, TK, d_k), lambda b, qi, ki: (b, 0, ki, 0)),
                pl.BlockSpec((1, numheads, TK, d_v), lambda b, qi, ki: (b, 0, ki, 0)),
                pl.BlockSpec((1, TQ, D), lambda b, qi, ki: (b, qi, 0)),
                pl.BlockSpec((numheads, d_v, D), lambda b, qi, ki: (0, 0, 0)),
                pl.BlockSpec((1, D), lambda b, qi, ki: (0, 0)),
                pl.BlockSpec((1, D), lambda b, qi, ki: (0, 0)),
                pl.BlockSpec((1, D), lambda b, qi, ki: (0, 0)),
            ],
            out_specs=pl.BlockSpec((1, TQ, D), lambda b, qi, ki: (b, qi, 0)),
            scratch_shapes=[pltpu.VMEM((numheads, TQ, 1), jnp.float32),
                            pltpu.VMEM((numheads, TQ, 1), jnp.float32),
                            pltpu.VMEM((numheads, TQ, d_v), jnp.float32)]),
        compiler_params=cp(("parallel", "parallel", "arbitrary")),
    )(q4, k4, v4, x, wo3, params["bo"], params["g1"], params["b1"])

    # ---- Kernel 3: FFN (dff-blocked) + residual + LN2 ------------------------
    n2 = n.reshape(R, D)
    out2 = pl.pallas_call(
        functools.partial(_ffn_ln_kernel, eps=eps, compute_dtype=cd),
        out_shape=jax.ShapeDtypeStruct((R, D), x.dtype),
        grid_spec=pltpu.PrefetchScalarGridSpec(
            num_scalar_prefetch=0,
            grid=(R // TR, dff // TF),
            in_specs=[
                pl.BlockSpec((TR, D), lambda r, f: (r, 0)),
                pl.BlockSpec((D, TF), lambda r, f: (0, f)),
                pl.BlockSpec((1, TF), lambda r, f: (0, f)),
                pl.BlockSpec((TF, D), lambda r, f: (f, 0)),
                pl.BlockSpec((1, D), lambda r, f: (0, 0)),
                pl.BlockSpec((1, D), lambda r, f: (0, 0)),
                pl.BlockSpec((1, D), lambda r, f: (0, 0)),
            ],
            out_specs=pl.BlockSpec((TR, D), lambda r, f: (r, 0)),
            scratch_shapes=[pltpu.VMEM((TR, D), jnp.float32)]),
        compiler_params=cp(("parallel", "arbitrary")),
    )(n2, wa, params["ba"], wb, params["bb"], params["g2"], params["b2"])

    return out2.reshape(B, S, D)


# ---------------------------------------------------------------------------
# Pure-JAX f32 reference mirroring the PyTorch forward.
# ---------------------------------------------------------------------------
def reference_block(x, params, *, numheads, scale=True, eps=1e-5):
    B, S, D = x.shape
    d_k = params["wq"].shape[1] // numheads
    d_v = params["wv"].shape[1] // numheads
    q = (x @ params["wq"] + params["bq"]).reshape(B, S, numheads, d_k)
    k = (x @ params["wk"] + params["bk"]).reshape(B, S, numheads, d_k)
    v = (x @ params["wv"] + params["bv"]).reshape(B, S, numheads, d_v)
    w = jnp.einsum("bshd,bzhd->bhsz", q, k)
    if scale:
        w = w / math.sqrt(d_k)
    w = jax.nn.softmax(w, axis=-1)
    vw = jnp.einsum("bhsz,bzhd->bshd", w, v).reshape(B, S, numheads * d_v)
    a = vw @ params["wo"] + params["bo"]

    def ln(y, g, b):
        mu = jnp.mean(y, axis=-1, keepdims=True)
        var = jnp.mean((y - mu) ** 2, axis=-1, keepdims=True)
        return (y - mu) * jax.lax.rsqrt(var + eps) * g + b

    n = ln(x + a, params["g1"], params["b1"])
    m = jnp.maximum(n @ params["wa"] + params["ba"], 0.0) @ params["wb"] + params["bb"]
    return ln(n + m, params["g2"], params["b2"])


def init_params(key, indim, numheads, dff):
    d_k = indim // numheads
    d_v = indim // numheads
    ks = jax.random.split(key, 6)
    std_qk = math.sqrt(2.0 / (indim + d_k))
    std_v = math.sqrt(2.0 / (indim + d_v))
    std_ff = math.sqrt(2.0 / (indim + dff))
    std_o = math.sqrt(2.0 / (indim + numheads * d_v))  # xavier-normal
    return {
        "wq": jax.random.normal(ks[0], (indim, numheads * d_k), jnp.float32) * std_qk,
        "bq": jnp.zeros((1, numheads * d_k), jnp.float32),
        "wk": jax.random.normal(ks[1], (indim, numheads * d_k), jnp.float32) * std_qk,
        "bk": jnp.zeros((1, numheads * d_k), jnp.float32),
        "wv": jax.random.normal(ks[2], (indim, numheads * d_v), jnp.float32) * std_v,
        "bv": jnp.zeros((1, numheads * d_v), jnp.float32),
        "wo": jax.random.normal(ks[3], (numheads * d_v, indim), jnp.float32) * std_o,
        "bo": jnp.zeros((1, indim), jnp.float32),
        "g1": jnp.ones((1, indim), jnp.float32),
        "b1": jnp.zeros((1, indim), jnp.float32),
        "wa": jax.random.normal(ks[4], (indim, dff), jnp.float32) * std_ff,
        "ba": jnp.zeros((1, dff), jnp.float32),
        "wb": jax.random.normal(ks[5], (dff, indim), jnp.float32) * std_ff,
        "bb": jnp.zeros((1, indim), jnp.float32),
        "g2": jnp.ones((1, indim), jnp.float32),
        "b2": jnp.zeros((1, indim), jnp.float32),
    }


if __name__ == "__main__":
    # TODO(synk): dropout / relpos / causal (bidir=False) / cell-mode paths are
    # not implemented (module defaults: eval mode, relpos=False, bidir=True).
    B, S, D, H = 2, 16, 64, 4
    dff = 4 * D

    key = jax.random.PRNGKey(0)
    kx, kp = jax.random.split(key)
    x = jax.random.normal(kx, (B, S, D), jnp.float32)
    params = init_params(kp, D, H, dff)

    ref = reference_block(x, params, numheads=H)

    # Block sizes chosen so every grid has >1 step (exercises online softmax
    # across kv tiles and dff accumulation across feed-forward blocks).
    blocks = dict(q_block=8, kv_block=8, row_block=16, ff_block=128)

    # f32 compute path: tight structural check (online softmax, head folding,
    # dff-blocked accumulation, folded q-scaling).
    out_f32 = transformer_encoder_block(
        x, params, numheads=H, compute_dtype=jnp.float32, **blocks)
    out_f32 = jax.block_until_ready(out_f32)
    assert out_f32.shape == (B, S, D)
    assert jnp.allclose(out_f32, ref, atol=1e-2, rtol=1e-2), "f32 path mismatch"

    # bf16 MXU-operand path (production default): looser tolerance vs f32 ref.
    out_bf16 = transformer_encoder_block(
        x, params, numheads=H, compute_dtype=jnp.bfloat16, **blocks)
    out_bf16 = jax.block_until_ready(out_bf16)
    assert out_bf16.shape == (B, S, D)
    assert jnp.allclose(out_bf16, ref, atol=8e-2, rtol=8e-2), "bf16 path mismatch"

    print("KERNEL_OK")
</pallas_src>

<mosaic_0001>
module attributes {stable_mosaic.version = 11 : i64} {
  func.func @_qkv_proj_kernel(%arg0: i32, %arg1: memref<16x64xf32, #tpu.memory_space<vmem>>, %arg2: memref<64x64xf32, #tpu.memory_space<vmem>>, %arg3: memref<1x64xf32, #tpu.memory_space<vmem>>, %arg4: memref<64x64xf32, #tpu.memory_space<vmem>>, %arg5: memref<1x64xf32, #tpu.memory_space<vmem>>, %arg6: memref<64x64xf32, #tpu.memory_space<vmem>>, %arg7: memref<1x64xf32, #tpu.memory_space<vmem>>, %arg8: memref<16x64xf32, #tpu.memory_space<vmem>>, %arg9: memref<16x64xf32, #tpu.memory_space<vmem>>, %arg10: memref<16x64xf32, #tpu.memory_space<vmem>>) attributes {dimension_semantics = [#tpu.dimension_semantics<parallel>], iteration_bounds = array<i64: 2>, scalar_prefetch = 0 : i64, scratch_operands = 0 : i64, tpu.core_type = #tpu.core_type<tc>, window_params = [{transform_indices = @transform_0, window_bounds = array<i64: 16, 64>}, {pipeline_mode = #tpu.pipeline_mode<synchronous>, transform_indices = @transform_1, window_bounds = array<i64: 64, 64>}, {pipeline_mode = #tpu.pipeline_mode<synchronous>, transform_indices = @transform_2, window_bounds = array<i64: 1, 64>}, {pipeline_mode = #tpu.pipeline_mode<synchronous>, transform_indices = @transform_3, window_bounds = array<i64: 64, 64>}, {pipeline_mode = #tpu.pipeline_mode<synchronous>, transform_indices = @transform_4, window_bounds = array<i64: 1, 64>}, {pipeline_mode = #tpu.pipeline_mode<synchronous>, transform_indices = @transform_5, window_bounds = array<i64: 64, 64>}, {pipeline_mode = #tpu.pipeline_mode<synchronous>, transform_indices = @transform_6, window_bounds = array<i64: 1, 64>}, {transform_indices = @transform_7, window_bounds = array<i64: 16, 64>}, {transform_indices = @transform_8, window_bounds = array<i64: 16, 64>}, {transform_indices = @transform_9, window_bounds = array<i64: 16, 64>}]} {
    %c0 = arith.constant 0 : index
    %c0_0 = arith.constant 0 : index
    %0 = vector.load %arg1[%c0, %c0_0] : memref<16x64xf32, #tpu.memory_space<vmem>>, vector<16x64xf32>
    %c0_1 = arith.constant 0 : index
    %c0_2 = arith.constant 0 : index
    %1 = vector.load %arg2[%c0_1, %c0_2] : memref<64x64xf32, #tpu.memory_space<vmem>>, vector<64x64xf32>
    %cst = arith.constant dense<0.000000e+00> : vector<16x64xf32>
    %2 = tpu.matmul %0, %1, %cst {dimension_numbers = #tpu.dot_dimension_numbers<[1], [0], [0], [1], [0, 0, 1, 1], [], []>} : vector<16x64xf32>, vector<64x64xf32>, vector<16x64xf32> -> vector<16x64xf32>
    %c0_3 = arith.constant 0 : index
    %c0_4 = arith.constant 0 : index
    %3 = vector.load %arg3[%c0_3, %c0_4] : memref<1x64xf32, #tpu.memory_space<vmem>>, vector<1x64xf32>
    %4 = vector.broadcast %3 : vector<1x64xf32> to vector<16x64xf32>
    %5 = arith.addf %2, %4 : vector<16x64xf32>
    %c0_5 = arith.constant 0 : index
    %c0_6 = arith.constant 0 : index
    %6 = vector.load %arg4[%c0_5, %c0_6] : memref<64x64xf32, #tpu.memory_space<vmem>>, vector<64x64xf32>
    %cst_7 = arith.constant dense<0.000000e+00> : vector<16x64xf32>
    %7 = tpu.matmul %0, %6, %cst_7 {dimension_numbers = #tpu.dot_dimension_numbers<[1], [0], [0], [1], [0, 0, 1, 1], [], []>} : vector<16x64xf32>, vector<64x64xf32>, vector<16x64xf32> -> vector<16x64xf32>
    %c0_8 = arith.constant 0 : index
    %c0_9 = arith.constant 0 : index
    %8 = vector.load %arg5[%c0_8, %c0_9] : memref<1x64xf32, #tpu.memory_space<vmem>>, vector<1x64xf32>
    %9 = vector.broadcast %8 : vector<1x64xf32> to vector<16x64xf32>
    %10 = arith.addf %7, %9 : vector<16x64xf32>
    %c0_10 = arith.constant 0 : index
    %c0_11 = arith.constant 0 : index
    %11 = vector.load %arg6[%c0_10, %c0_11] : memref<64x64xf32, #tpu.memory_space<vmem>>, vector<64x64xf32>
    %cst_12 = arith.constant dense<0.000000e+00> : vector<16x64xf32>
    %12 = tpu.matmul %0, %11, %cst_12 {dimension_numbers = #tpu.dot_dimension_numbers<[1], [0], [0], [1], [0, 0, 1, 1], [], []>} : vector<16x64xf32>, vector<64x64xf32>, vector<16x64xf32> -> vector<16x64xf32>
    %c0_13 = arith.constant 0 : index
    %c0_14 = arith.constant 0 : index
    %13 = vector.load %arg7[%c0_13, %c0_14] : memref<1x64xf32, #tpu.memory_space<vmem>>, vector<1x64xf32>
    %14 = vector.broadcast %13 : vector<1x64xf32> to vector<16x64xf32>
    %15 = arith.addf %12, %14 : vector<16x64xf32>
    %c0_15 = arith.constant 0 : index
    %c0_16 = arith.constant 0 : index
    %16 = vector.load %arg8[%c0_15, %c0_16] : memref<16x64xf32, #tpu.memory_space<vmem>>, vector<16x64xf32>
    tpu.vector_store %arg8[%c0_15, %c0_16], %5 {strides = array<i32>} : memref<16x64xf32, #tpu.memory_space<vmem>>, vector<16x64xf32>,
    %c0_17 = arith.constant 0 : index
    %c0_18 = arith.constant 0 : index
    %17 = vector.load %arg9[%c0_17, %c0_18] : memref<16x64xf32, #tpu.memory_space<vmem>>, vector<16x64xf32>
    tpu.vector_store %arg9[%c0_17, %c0_18], %10 {strides = array<i32>} : memref<16x64xf32, #tpu.memory_space<vmem>>, vector<16x64xf32>,
    %c0_19 = arith.constant 0 : index
    %c0_20 = arith.constant 0 : index
    %18 = vector.load %arg10[%c0_19, %c0_20] : memref<16x64xf32, #tpu.memory_space<vmem>>, vector<16x64xf32>
    tpu.vector_store %arg10[%c0_19, %c0_20], %15 {strides = array<i32>} : memref<16x64xf32, #tpu.memory_space<vmem>>, vector<16x64xf32>,
    return
  }
  func.func @transform_0(%arg0: i32) -> (i32, i32) {
    %c0_i32 = arith.constant 0 : i32
    %c0_i32_0 = arith.constant 0 : i32
    return %arg0, %c0_i32 : i32, i32
  }
  func.func @transform_1(%arg0: i32) -> (i32, i32) {
    %c0_i32 = arith.constant 0 : i32
    %c0_i32_0 = arith.constant 0 : i32
    %c0_i32_1 = arith.constant 0 : i32
    return %c0_i32, %c0_i32_0 : i32, i32
  }
  func.func @transform_2(%arg0: i32) -> (i32, i32) {
    %c0_i32 = arith.constant 0 : i32
    %c0_i32_0 = arith.constant 0 : i32
    %c0_i32_1 = arith.constant 0 : i32
    return %c0_i32, %c0_i32_0 : i32, i32
  }
  func.func @transform_3(%arg0: i32) -> (i32, i32) {
    %c0_i32 = arith.constant 0 : i32
    %c0_i32_0 = arith.constant 0 : i32
    %c0_i32_1 = arith.constant 0 : i32
    return %c0_i32, %c0_i32_0 : i32, i32
  }
  func.func @transform_4(%arg0: i32) -> (i32, i32) {
    %c0_i32 = arith.constant 0 : i32
    %c0_i32_0 = arith.constant 0 : i32
    %c0_i32_1 = arith.constant 0 : i32
    return %c0_i32, %c0_i32_0 : i32, i32
  }
  func.func @transform_5(%arg0: i32) -> (i32, i32) {
    %c0_i32 = arith.constant 0 : i32
    %c0_i32_0 = arith.constant 0 : i32
    %c0_i32_1 = arith.constant 0 : i32
    return %c0_i32, %c0_i32_0 : i32, i32
  }
  func.func @transform_6(%arg0: i32) -> (i32, i32) {
    %c0_i32 = arith.constant 0 : i32
    %c0_i32_0 = arith.constant 0 : i32
    %c0_i32_1 = arith.constant 0 : i32
    return %c0_i32, %c0_i32_0 : i32, i32
  }
  func.func @transform_7(%arg0: i32) -> (i32, i32) {
    %c0_i32 = arith.constant 0 : i32
    %c0_i32_0 = arith.constant 0 : i32
    return %arg0, %c0_i32 : i32, i32
  }
  func.func @transform_8(%arg0: i32) -> (i32, i32) {
    %c0_i32 = arith.constant 0 : i32
    %c0_i32_0 = arith.constant 0 : i32
    return %arg0, %c0_i32 : i32, i32
  }
  func.func @transform_9(%arg0: i32) -> (i32, i32) {
    %c0_i32 = arith.constant 0 : i32
    %c0_i32_0 = arith.constant 0 : i32
    return %arg0, %c0_i32 : i32, i32
  }
}

</mosaic_0001>

<bundles_post_ra>
// kernel: tpu_custom_call.1
= control target key start
LH: loop header
LB: loop body
LE: loop exit
PB: predicated region body
PF: predicated region fallthrough
CT: control target
= control target key end

     0   :  { %s1887_s0 = inlined_call_operand.hbm [shape: f32[32,64], index: 0, kind: input, shape index: {}]   ;;  %s1888_s1 = inlined_call_operand.hbm [shape: f32[64,64], index: 1, kind: input, shape index: {}]   ;;  %s1889_s2 = inlined_call_operand.vmem [shape: f32[1,64], index: 2, kind: input, shape index: {}]   ;;  %s1890_s3 = inlined_call_operand.hbm [shape: f32[64,64], index: 3, kind: input, shape index: {}]   ;;  %s1891_s4 = inlined_call_operand.vmem [shape: f32[1,64], index: 4, kind: input, shape index: {}]   ;;  %s1892_s5 = inlined_call_operand.hbm [shape: f32[64,64], index: 5, kind: input, shape index: {}]   ;;  %s1893_s6 = inlined_call_operand.vmem [shape: f32[1,64], index: 6, kind: input, shape index: {}]   ;;  %s1894_s7 = inlined_call_operand.hbm [shape: f32[32,64], index: 7, kind: output, shape index: {0}]   ;;  %s1895_s8 = inlined_call_operand.hbm [shape: f32[32,64], index: 8, kind: output, shape index: {1}]   ;;  %s1896_s9 = inlined_call_operand.hbm [shape: f32[32,64], index: 9, kind: output, shape index: {2}]  }
   0x1   :  { %1904 = sst [smem:[#allocation21_spill]] %s1887_s0 }
   0x2   :  { %1905 = sst [smem:[#allocation22_spill]] %s1888_s1 }
   0x3   :  { %1906 = sst [smem:[#allocation23_spill]] %s1896_s9 }
   0x4   :  { %15 = vsyncpa [#allocation3], 0 }
   0x5   :  { %17 = vsyncpa [#allocation3 + $0x1], 0 }
   0x6   :  { %18 = vsyncpa [#allocation6], 0 }
   0x7   :  { %19 = vsyncpa [#allocation9], 0 }
   0x8   :  { %20 = vsyncpa [#allocation4], 0 }
   0x9   :  { %22 = vsyncpa [#allocation4 + $0x1], 0 }
   0xa   :  { %23 = vsyncpa [#allocation12], 0 }
   0xb   :  { %25 = vsyncpa [#allocation12 + $0x1], 0  ;;  %s1499_s30 = smov 0   ;;  %s1501_s10 = smov 0  }
   0xc   :  { %s1503_s11 = smov 0   ;;  %s1505_s12 = smov 0  }
   0xd LB: > { %1907 = sst [smem:[#allocation19_spill]] %s1424_s30  ;;  %s1520_s13 = sadd.s32 4294967295, %s1436_s12   ;;  %s1436_s12 = sphi %s1505_s12, %s1937_s12   ;;  %s1432_s11 = sphi %s1503_s11, %s1936_s11   ;;  %s1428_s10 = sphi %s1501_s10, %s1935_s10   ;;  %s1424_s30 = sphi %s1499_s30, %s1934_s30  }
   0xe   : > { %s1898_s14 = sadd.s32 4294967294, %s1436_s12   ;;  %p51_p0 = scmp.ne.s32.totalorder %s1428_s10, %s1424_s30 }
   0xf   : > { %p1897_p1 = scmp.eq.s32.totalorder %s1520_s13, 0  ;;  %p207_p3 = scmp.eq.s32.totalorder %s1898_s14, 1 }
  0x10   : > { %p922_p5 = scmp.ge.s32.totalorder %s1436_s12, 1  ;;  %p266_p7 = scmp.lt.s32.totalorder %s1436_s12, 3 }
  0x11   : > { %p1531_p4 = por %p1897_p1, %p51_p0  ;;  %p1536_p6 = por %p207_p3, %p51_p0 }
  0x12   : > { %p1541_p8 = pnand %p922_p5, %p266_p7  ;;  %s1438_s18 = smov [#allocation5]  }
  0x13   : > { %s1908_s15 = scalar_select %p1531_p4, 1, 0 }
  0x14   : > { %s1909_s16 = scalar_select %p1536_p6, 1, 0 }
  0x15   : > { %s1911_s17 = scalar_select %p1541_p8, 1, 0 }
  0x16   : > { %1910 = sst [smem:[#allocation20_spill]] %s1909_s16  ;;  %s278_s19 = sshll.u32 %s1438_s18, 4  ;;  %s1545_s19 = int_to_ptr.vmem [resolvable:$true] %s278_s19 }
  0x17   : > { %p1117_p9 = pneg %p1541_p8  ;;  %s1439_s21 = smov [#allocation7]  }
  0x18   : > { %s294_s22 = sshll.u32 %s1439_s21, 4  ;;  %s1440_s23 = smov [#allocation8]   ;;  %s1556_s22 = int_to_ptr.vmem [resolvable:$true] %s294_s22 }
  0x19   : > { %p1552_p11 = pnand %p1117_p9, %p1897_p1  ;;  %s1558_s24 = sshll.u32 %s1440_s23, 4  ;;  %s311_s24 = int_to_ptr.vmem [resolvable:$true] %s1558_s24 }
  0x1a   : > { %s1913_s1 = sld [smem:[#allocation22_spill]] }
  0x1b   : > { %p1568_p13 = pneg %p1552_p11 }
  0x20   : > { %s1188_s27 = scalar_lea.hbm %s1913_s1, 1024 }
  0x21   : > { %p1189_p12 = scmp.ne.s32.totalorder %s1913_s1, %s1188_s27  ;;  %p1195_p5 = scmp.lt.u32.totalorder %s1188_s27, %s1913_s1 }
  0x23   : > { %p1191_p0 = pnand %p1568_p13, %p1189_p12 }
  0x25   : > { %p1192_p3 = pneg %p1191_p0 }
  0x27   : > { %p1197_p7 = pnand %p1195_p5, %p1192_p3 }
  0x29   : > { %1200 = shalt.err (!%p1197_p7)
}
  0x2a   : > { %s1201_s25 = scalar_lea.vmem %s1545_s19, 1024  ;;  %p1209_p2 = scmp.lt.s32.totalorder %s1545_s19, %s1545_s19 }
  0x2b   : > { %p1202_p9 = scmp.ne.s32.totalorder %s1545_s19, %s1201_s25  ;;  %p1210_p6 = scmp.lt.s32.totalorder %s1201_s25, %s1201_s25 }
  0x2d   : > { %p1204_p10 = pnand %p1202_p9, %p1568_p13  ;;  %p1211_p12 = por %p1210_p6, %p1209_p2 }
  0x2f   : > { %p1205_p1 = pneg %p1204_p10 }
  0x31   : > { %p1212_p0 = pnand %p1211_p12, %p1205_p1 }
  0x33   : > { %1215 = shalt.err (!%p1212_p0)
}
  0x34   : > { %s1441_s26 = smov 128   ;;  %s1442_s27 = smov 8  }
  0x35   : > { %1120 = dma.hbm_to_vmem [thread:$0]  (!%p1552_p11), %s1913_s1, 1024, %s1545_s19, [#allocation6], %s1441_s26, %s1441_s26, %s1442_s27  }
  0x36   : > { %s1216_s25 = scalar_lea.hbm %s1890_s3, 1024 }
  0x37   : > { %p1217_p1 = scmp.ne.s32.totalorder %s1890_s3, %s1216_s25  ;;  %p1223_p10 = scmp.lt.u32.totalorder %s1216_s25, %s1890_s3 }
  0x39   : > { %p1219_p2 = pnand %p1217_p1, %p1568_p13 }
  0x3b   : > { %p1220_p6 = pneg %p1219_p2 }
  0x3d   : > { %p1225_p3 = pnand %p1223_p10, %p1220_p6 }
  0x3f   : > { %1228 = shalt.err (!%p1225_p3)
}
  0x40   : > { %s1229_s19 = scalar_lea.vmem %s1556_s22, 1024  ;;  %p1237_p12 = scmp.lt.s32.totalorder %s1556_s22, %s1556_s22 }
  0x41   : > { %p1230_p5 = scmp.ne.s32.totalorder %s1556_s22, %s1229_s19  ;;  %p1238_p0 = scmp.lt.s32.totalorder %s1229_s19, %s1229_s19 }
  0x43   : > { %p1232_p7 = pnand %p1230_p5, %p1568_p13  ;;  %p1239_p1 = por %p1238_p0, %p1237_p12 }
  0x45   : > { %p1233_p9 = pneg %p1232_p7 }
  0x47   : > { %p1240_p2 = pnand %p1239_p1, %p1233_p9 }
  0x49   : > { %1243 = shalt.err (!%p1240_p2)
}
  0x4a   : > { %1123 = dma.hbm_to_vmem [thread:$0]  (!%p1552_p11), %s1890_s3, 1024, %s1556_s22, [#allocation6], %s1441_s26, %s1441_s26, %s1442_s27  }
  0x4b   : > { %s1244_s28 = scalar_lea.hbm %s1892_s5, 1024 }
  0x4c   : > { %p1245_p6 = scmp.ne.s32.totalorder %s1892_s5, %s1244_s28  ;;  %p1251_p5 = scmp.lt.u32.totalorder %s1244_s28, %s1892_s5 }
  0x4e   : > { %p1247_p10 = pnand %p1245_p6, %p1568_p13 }
  0x50   : > { %p1248_p3 = pneg %p1247_p10 }
  0x52   : > { %p1253_p7 = pnand %p1251_p5, %p1248_p3 }
  0x54   : > { %1256 = shalt.err (!%p1253_p7)
}
  0x55   : > { %s1257_s19 = scalar_lea.vmem %s311_s24, 1024  ;;  %p1265_p1 = scmp.lt.s32.totalorder %s311_s24, %s311_s24 }
  0x56   : > { %p1258_p9 = scmp.ne.s32.totalorder %s311_s24, %s1257_s19  ;;  %p1266_p2 = scmp.lt.s32.totalorder %s1257_s19, %s1257_s19 }
  0x58   : > { %p1260_p12 = pnand %p1258_p9, %p1568_p13  ;;  %p1267_p4 = por %p1266_p2, %p1265_p1 }
  0x5a   : > { %p1261_p0 = pneg %p1260_p12 }
  0x5c   : > { %p1268_p8 = pnand %p1267_p4, %p1261_p0 }
  0x5e   : > { %1271 = shalt.err (!%p1268_p8)
}
  0x5f   : > { %1126 = dma.hbm_to_vmem [thread:$0]  (!%p1552_p11), %s1892_s5, 1024, %s311_s24, [#allocation9], %s1441_s26, %s1441_s26, %s1442_s27  }
  0x60   : > { %s1641_s18 = sadd.s32 1, %s1436_s12   ;;  %s38_s30 = sadd.s32 1, %s1432_s11 }
  0x61   : > { %s35_s20 = ssub.s32 %s1436_s12, %s1641_s18  ;;  %p45_p8 = scmp.ne.s32.totalorder %s1432_s11, %s1428_s10 }
  0x62   : > { %p36_p4 = scmp.eq.s32.totalorder %s35_s20, 0  ;;  %p46_p13 = scmp.eq.s32.totalorder %s1436_s12, 0 }
  0x63   : > { %p1144_p6 = scmp.lt.s32.totalorder %s1436_s12, 2  ;;  %p1915_p3 = scmp.eq.s32.totalorder %s1520_s13, 1 }
  0x64   : > { %s1651_s14 = scalar_select %p36_p4, %s1432_s11, %s38_s30  }
  0x65   : > { %p47_p10 = por %p46_p13, %p45_p8  ;;  %p1655_p5 = por %p1915_p3, %p45_p8 }
  0x66   : > { %s327_s28 = sand.u32 1, %s1432_s11   ;;  %s958_s29 = sshll.u32 %s1436_s12, 8 }
  0x67   : > { %s927_s24 = sshll.u32 %s327_s28, 4  ;;  %s1917_s0 = sld [smem:[#allocation21_spill]] }
  0x68   : > { %s331_s19 = scalar_lea.vmem [#allocation2], %s927_s24  ;;  %p1666_p11 = pnand %p1144_p6, %p47_p10 }
  0x69   : > { %s338_s22 = sshll.u32 %s331_s19, 4  ;;  %s1672_s20 = scalar_lea.sflag [#allocation3], %s327_s28  ;;  %s1670_s22 = int_to_ptr.vmem [resolvable:$true] %s338_s22 }
  0x6a   : > { %p1274_p9 = pneg %p1666_p11 }
  0x6d   : > { %s1664_s25 = scalar_lea.hbm %s1917_s0, %s958_s29  ;;  %s1277_s21 = scalar_lea.hbm %s1917_s0, 512 }
  0x6e   : > { %s1272_s30 = scalar_lea.hbm %s1664_s25, 256  ;;  %p1278_p1 = scmp.lt.u32.totalorder %s1664_s25, %s1917_s0 }
  0x6f   : > { %p1273_p7 = scmp.ne.s32.totalorder %s1664_s25, %s1272_s30  ;;  %p1279_p2 = scmp.lt.u32.totalorder %s1277_s21, %s1272_s30 }
  0x70   : > { %p1281_p8 = scmp.lt.u32.totalorder %s1272_s30, %s1664_s25 }
  0x71   : > { %p1275_p12 = pnand %p1274_p9, %p1273_p7  ;;  %p1280_p4 = por %p1279_p2, %p1278_p1 }
  0x73   : > { %p1276_p0 = pneg %p1275_p12  ;;  %p1282_p13 = por %p1281_p8, %p1280_p4 }
  0x75   : > { %p1283_p6 = pnand %p1282_p13, %p1276_p0 }
  0x77   : > { %1286 = shalt.err (!%p1283_p6)
}
  0x78   : > { %s1287_s28 = scalar_lea.vmem %s1670_s22, 256  ;;  %s1443_s29 = smov [#allocation2]  }
  0x79   : > { %p1288_p10 = scmp.ne.s32.totalorder %s1670_s22, %s1287_s28  ;;  %s1292_s24 = sshll.u32 %s1443_s29, 4  ;;  %s1293_s24 = int_to_ptr.vmem [resolvable:$false] %s1292_s24 }
  0x7a   : > { %s1294_s23 = scalar_lea.vmem %s1293_s24, 512  ;;  %p1295_p12 = scmp.lt.s32.totalorder %s1670_s22, %s1293_s24 }
  0x7b   : > { %p1290_p3 = pnand %p1288_p10, %p1274_p9  ;;  %p1296_p1 = scmp.lt.s32.totalorder %s1294_s23, %s1287_s28 }
  0x7d   : > { %p1291_p7 = pneg %p1290_p3  ;;  %p1297_p2 = por %p1296_p1, %p1295_p12 }
  0x7f   : > { %p1298_p4 = pnand %p1297_p2, %p1291_p7 }
  0x81   : > { %1301 = shalt.err (!%p1298_p4)
}
  0x82   : > { %1130 = dma.hbm_to_vmem [thread:$0]  (!%p1666_p11), %s1664_s25, 256, %s1670_s22, %s1672_s20, %s1441_s26, %s1441_s26, %s1442_s27  }
  0x83   : > { %p1919_p9 = scmp.ne.s32.totalorder %s1911_s17, 0 }
  0x84   : > { %s1706_s30 = sand.u32 (!%p1919_p9), 1, %s1428_s10   ;;  %p1920_p0 = scmp.ne.s32.totalorder (!%p1919_p9), %s1908_s15, 0 }
  0x85   : > { %350 = sbr.rel (%p1919_p9) target bundleno = 446 (0x1be), region = 48  ;;  %s1709_s21 = sshll.u32 (!%p1919_p9), %s1706_s30, 4 }
  0x86   : > { %s353_s9 = scalar_lea.sflag (!%p1919_p9), [#allocation3], %s1706_s30  ;;  %s356_s19 = scalar_lea.vmem (!%p1919_p9), [#allocation2], %s1709_s21 }
  0x8c   : > { %1403 = dma.done.wait (%p1920_p0), %s353_s9, 256  }
  0x8d   : > { %1405 = vsyncadd (%p1920_p0), %s353_s9, 4294967040  ;;  %p1921_p11 = scmp.eq.s32.totalorder %s1520_s13, 0 }
  0x8f   : > { %1407 = dma.done.wait (%p1921_p11), [#allocation6], 2048   ;;  %p1922_p8 = pmov %p1921_p11 }
  0x91   : > { %1409 = vsyncadd (%p1922_p8), [#allocation6], 4294965248  ;;  %p1923_p13 = pmov %p1922_p8 }
  0x92   : > { %p1924_p6 = pmov %p1922_p8 }
  0x93   : > { %1411 = dma.done.wait (%p1923_p13), [#allocation9], 1024  }
  0x94   : > { %1413 = vsyncadd (%p1924_p6), [#allocation9], 4294966272  ;;  %v419_v0 = vld [vmem:[#allocation5] sm:$0xff]  ;;  %v420_v1 = vld [vmem:[#allocation5 + $0x8] sm:$0xff]  ;;  %vm434_vm0 = vcmask 523264   ;;  %s398_s15 = scalar_lea.vmem [#allocation10], %s1709_s21 }
  0x95   : > { %v421_v2 = vld [vmem:[#allocation5 + $0x10] sm:$0xff]  ;;  %v1049_v3 = vpack.c.bf16 %v420_v1, %v419_v0  ;;  %v422_v4 = vld [vmem:[#allocation5 + $0x18] sm:$0xff]  ;;  %v423_v6 = vld [vmem:[#allocation5 + $0x20] sm:$0xff]  ;;  %s726_s17 = sshll.u32 %s398_s15, 4  ;;  %s1742_s25 = sshll.u32 %s1520_s13, 8  ;;  %s1739_s17 = int_to_ptr.vmem [resolvable:$true] %s726_s17 }
  0x96   : > { %v1053_v5 = vpack.c.bf16 %v422_v4, %v421_v2  ;;  %v424_v7 = vld [vmem:[#allocation5 + $0x28] sm:$0xff]  ;;  %v516_v8 = vld [vmem:[#allocation7] sm:$0xff]  ;;  %v518_v12 = vld [vmem:[#allocation7 + $0x10] sm:$0xff]  ;;  %s1745_s22 = scalar_lea.vmem [#allocation11], %s1709_s21  ;;  %s1766_s29 = scalar_lea.hbm %s1895_s8, %s1742_s25 }
  0x97   : > { %1050 = vmatprep.subr.bf16.mxu0 %v1049_v3  ;;  %v517_v9 = vld [vmem:[#allocation7 + $0x8] sm:$0xff]  ;;  %v417_v10 = vld [vmem:[%s356_s19] sm:$0xff]  ;;  %v1057_v13 = vpack.c.bf16 %v424_v7, %v423_v6  ;;  %v519_v15 = vld [vmem:[#allocation7 + $0x18] sm:$0xff]  ;;  %s742_s20 = sshll.u32 %s1745_s22, 4  ;;  %s1302_s23 = scalar_lea.vmem %s1739_s17, 256  ;;  %s1759_s20 = int_to_ptr.vmem [resolvable:$true] %s742_s20 }
  0x98   : > { %1052 = vmatpush3.bf16.msra.mxu0 %v1049_v3  ;;  %v1065_v11 = vpack.c.bf16 %v517_v9, %v516_v8  ;;  %1008 = vmatprep.mubr.msk.f32.mxu0 %vm434_vm0, %v417_v10  ;;  %v425_v14 = vld [vmem:[#allocation5 + $0x30] sm:$0xff]  ;;  %v426_v16 = vld [vmem:[#allocation5 + $0x38] sm:$0xff]  ;;  %v1069_v17 = vpack.c.bf16 %v519_v15, %v518_v12  ;;  %v520_v18 = vld [vmem:[#allocation7 + $0x20] sm:$0xff]  ;;  %p1303_p10 = scmp.ne.s32.totalorder %s1739_s17, %s1302_s23  ;;  %s1444_s9 = smov [#allocation10]  }
  0x99   : > { %1054 = vmatprep.subr.bf16.mxu0 %v1053_v5  ;;  %1027 = vmatprep.mubr.msk.f32.mxu1 %vm434_vm0, %v417_v10  ;;  %v521_v19 = vld [vmem:[#allocation7 + $0x28] sm:$0xff]  ;;  %v1061_v21 = vpack.c.bf16 %v426_v16, %v425_v14  ;;  %v522_v22 = vld [vmem:[#allocation7 + $0x30] sm:$0xff]  ;;  %v523_v23 = vld [vmem:[#allocation7 + $0x38] sm:$0xff]  ;;  %s1306_s28 = sshll.u32 %s1444_s9, 4  ;;  %s1307_s28 = int_to_ptr.vmem [resolvable:$false] %s1306_s28 }
  0x9a   : > { %1066 = vmatprep.subr.bf16.mxu1 %v1065_v11  ;;  %v1073_v20 = vpack.c.bf16 %v521_v19, %v520_v18  ;;  %v606_v24 = vld [vmem:[#allocation8] sm:$0xff]  ;;  %v607_v25 = vld [vmem:[#allocation8 + $0x8] sm:$0xff]  ;;  %v1077_v26 = vpack.c.bf16 %v523_v23, %v522_v22  ;;  %v608_v28 = vld [vmem:[#allocation8 + $0x10] sm:$0xff]  ;;  %p1304_p3 = pnand %p1303_p10, %p1655_p5  ;;  %s1308_s0 = scalar_lea.vmem %s1307_s28, 512 }
  0x9b   : > { %1068 = vmatpush3.bf16.msra.mxu1 %v1065_v11  ;;  %v1081_v27 = vpack.c.bf16 %v607_v25, %v606_v24  ;;  %v609_v29 = vld [vmem:[#allocation8 + $0x18] sm:$0xff]  ;;  %v610_v32 = vld [vmem:[#allocation8 + $0x20] sm:$0xff]  ;;  %v611_v33 = vld [vmem:[#allocation8 + $0x28] sm:$0xff]  ;;  %p1309_p12 = scmp.lt.s32.totalorder %s1739_s17, %s1307_s28  ;;  %p1310_p1 = scmp.lt.s32.totalorder %s1308_s0, %s1302_s23 }
  0x9c   : > { %1056 = vmatpush3.bf16.msra.mxu0 %v1053_v5  ;;  %1070 = vmatprep.subr.bf16.mxu1 %v1069_v17  ;;  %v418_v30 = vld [vmem:[%s356_s19 + $0x8] sm:$0xff]  ;;  %v1085_v31 = vpack.c.bf16 %v609_v29, %v608_v28  ;;  %v1089_v34 = vpack.c.bf16 %v611_v33, %v610_v32  ;;  %v612_v35 = vld [vmem:[#allocation8 + $0x30] sm:$0xff]  ;;  %v938_v38 = vld [vmem:[%s1889_s2] ss:$0 sm:$0xff]  ;;  %s1756_s19 = scalar_lea.hbm %s1894_s7, %s1742_s25  ;;  %p1305_p7 = pneg %p1304_p3 }
  0x9d   : > { %1058 = vmatprep.subr.bf16.mxu0 %v1057_v13  ;;  %v613_v36 = vld [vmem:[#allocation8 + $0x38] sm:$0xff]  ;;  %v941_v42 = vld [vmem:[%s1891_s4] ss:$0 sm:$0xff]  ;;  %p1311_p2 = por %p1310_p1, %p1309_p12 }
  0x9e   : > { %v1093_v37 = vpack.c.bf16 %v613_v36, %v612_v35 }
  0x9f   : > { %1072 = vmatpush3.bf16.msra.mxu1 %v1069_v17  ;;  %p1312_p4 = pnand %p1311_p2, %p1305_p7 }
  0xa0   : > { %1060 = vmatpush3.bf16.msra.mxu0 %v1057_v13  ;;  %1074 = vmatprep.subr.bf16.mxu1 %v1073_v20 }
  0xa1   : > { %1062 = vmatprep.subr.bf16.mxu0 %v1061_v21 }
  0xa3   : > { %1076 = vmatpush3.bf16.msra.mxu1 %v1073_v20 }
  0xa4   : > { %1064 = vmatpush3.bf16.msra.mxu0 %v1061_v21  ;;  %1078 = vmatprep.subr.bf16.mxu1 %v1077_v26 }
  0xa5   : > { %1082 = vmatprep.subr.bf16.mxu0 %v1081_v27 }
  0xa7   : > { %1009 = vmatmul.mubr.msk.f32.vlgmr.msra.gmra.mrb[0].mxu0 %vm434_vm0, %v418_v30  ;;  %1080 = vmatpush3.bf16.msra.mxu1 %v1077_v26 }
  0xa8   : > { %1084 = vmatpush3.bf16.msra.mxu0 %v1081_v27  ;;  %1046 = vmatprep.mubr.msk.f32.mxu0 %vm434_vm0, %v417_v10 }
  0xa9   : > { %1086 = vmatprep.subr.bf16.mxu0 %v1085_v31 }
  0xaa   : > { %1028 = vmatmul.mubr.msk.f32.vlgmr.msra.gmra.mrb[0].mxu1 %vm434_vm0, %v418_v30 }
  0xac   : > { %1088 = vmatpush3.bf16.msra.mxu0 %v1085_v31 }
  0xad   : > { %1090 = vmatprep.subr.bf16.mxu0 %v1089_v34 }
  0xb0   : > { %1092 = vmatpush3.bf16.msra.mxu0 %v1089_v34 }
  0xb1   : > { %1094 = vmatprep.subr.bf16.mxu0 %v1093_v37 }
  0xb4   : > { %1096 = vmatpush3.bf16.msra.mxu0 %v1093_v37 }
  0xb7   : > { %1047 = vmatmul.mubr.msk.f32.vlgmr.msra.gmra.mrb[2].mxu0 %vm434_vm0, %v418_v30 }
 0x17a   : > { %v1010_v39 = vpop.f32.mrb[0].mxu0 }
 0x17b   : > { %v513_v40 = vadd.f32 %v1010_v39, %v938_v38  ;;  %v507_v41 = vpop.f32.mrb[1].mxu0 }
 0x17c   : > { %v508_v43 = vadd.f32 %v938_v38, %v507_v41 }
 0x17d   : > { %697 = vst.msk [vmem:[%s398_s15 + $0x8] sm:$0xff] %vm434_vm0, %v513_v40  ;;  %v1029_v44 = vpop.f32.mrb[0].mxu1 }
 0x17e   : > { %696 = vst.msk [vmem:[%s398_s15] sm:$0xff] %vm434_vm0, %v508_v43  ;;  %v603_v45 = vadd.f32 %v1029_v44, %v941_v42  ;;  %v597_v46 = vpop.f32.mrb[1].mxu1 }
 0x17f   : > { %v598_v47 = vadd.f32 %v941_v42, %v597_v46 }
 0x180   : > { %1315 = shalt.err (!%p1312_p4)
}
 0x181   : > { %s1316_s15 = scalar_lea.hbm %s1756_s19, 256  ;;  %s1320_s9 = scalar_lea.hbm %s1894_s7, 512 }
 0x182   : > { %p1317_p9 = scmp.ne.s32.totalorder %s1756_s19, %s1316_s15  ;;  %p1321_p8 = scmp.lt.u32.totalorder %s1756_s19, %s1894_s7 }
 0x183   : > { %p1322_p13 = scmp.lt.u32.totalorder %s1320_s9, %s1316_s15  ;;  %p1324_p10 = scmp.lt.u32.totalorder %s1316_s15, %s1756_s19 }
 0x184   : > { %p1318_p0 = pnand %p1317_p9, %p1655_p5 }
 0x185   : > { %p1323_p6 = por %p1322_p13, %p1321_p8 }
 0x186   : > { %p1319_p11 = pneg %p1318_p0 }
 0x187   : > { %p1325_p3 = por %p1324_p10, %p1323_p6 }
 0x189   : > { %p1326_p7 = pnand %p1325_p3, %p1319_p11 }
 0x18b   : > { %1329 = shalt.err (!%p1326_p7)
}
 0x18c   : > { %s1445_s0 = smov 128   ;;  %s1446_s24 = smov 8   ;;  %699 = vst.msk [vmem:[%s1745_s22 + $0x8] sm:$0xff] %vm434_vm0, %v603_v45  ;;  %698 = vst.msk [vmem:[%s1745_s22] sm:$0xff] %vm434_vm0, %v598_v47 }
 0x18d   : > { %s1925_s23 = scalar_lea.sflag [#allocation4], %s1706_s30  ;;  %s1926_s15 = sand.u32 1, %s1520_s13  }
 0x18e   : > { %1111 = dma.vmem_to_hbm [thread:$0]  (%p1655_p5), %s1739_s17, 256, %s1756_s19, %s1925_s23, %s1445_s0, %s1445_s0, %s1446_s24  }
 0x18f   : > { %s1801_s26 = scalar_lea.sflag [#allocation12], %s1926_s15  ;;  %s1330_s27 = scalar_lea.vmem %s1759_s20, 256 }
 0x190   : > { %p1331_p12 = scmp.ne.s32.totalorder %s1759_s20, %s1330_s27  ;;  %s1447_s9 = smov [#allocation11]  }
 0x191   : > { %s1334_s28 = sshll.u32 %s1447_s9, 4  ;;  %s1335_s28 = int_to_ptr.vmem [resolvable:$false] %s1334_s28 }
 0x192   : > { %p1332_p1 = pnand %p1331_p12, %p1655_p5  ;;  %s1336_s1 = scalar_lea.vmem %s1335_s28, 512 }
 0x193   : > { %p1337_p4 = scmp.lt.s32.totalorder %s1759_s20, %s1335_s28  ;;  %p1338_p9 = scmp.lt.s32.totalorder %s1336_s1, %s1330_s27 }
 0x194   : > { %p1333_p2 = pneg %p1332_p1 }
 0x195   : > { %p1339_p0 = por %p1338_p9, %p1337_p4 }
 0x197   : > { %p1340_p11 = pnand %p1339_p0, %p1333_p2 }
 0x199   : > { %1343 = shalt.err (!%p1340_p11)
}
 0x19a   : > { %s1344_s13 = scalar_lea.hbm %s1766_s29, 256  ;;  %s1348_s22 = scalar_lea.hbm %s1895_s8, 512 }
 0x19b   : > { %p1345_p8 = scmp.ne.s32.totalorder %s1766_s29, %s1344_s13  ;;  %p1349_p10 = scmp.lt.u32.totalorder %s1766_s29, %s1895_s8 }
 0x19c   : > { %p1350_p3 = scmp.lt.u32.totalorder %s1348_s22, %s1344_s13  ;;  %p1352_p12 = scmp.lt.u32.totalorder %s1344_s13, %s1766_s29 }
 0x19d   : > { %p1346_p13 = pnand %p1345_p8, %p1655_p5 }
 0x19e   : > { %p1351_p7 = por %p1350_p3, %p1349_p10 }
 0x19f   : > { %p1347_p6 = pneg %p1346_p13 }
 0x1a0   : > { %p1353_p1 = por %p1352_p12, %p1351_p7 }
 0x1a2   : > { %p1354_p2 = pnand %p1353_p1, %p1347_p6 }
 0x1a4   : > { %1357 = shalt.err (!%p1354_p2)
}
 0x1a5   : > { %1112 = dma.vmem_to_hbm [thread:$0]  (%p1655_p5), %s1759_s20, 256, %s1766_s29, %s1801_s26, %s1445_s0, %s1445_s0, %s1446_s24   ;;  %v1048_v49 = vpop.f32.mrb[2].mxu0 }
 0x1a6   : > { %v944_v48 = vld [vmem:[%s1893_s6] ss:$0 sm:$0xff]  ;;  %s412_s27 = scalar_lea.vmem [#allocation13], %s1709_s21  ;;  %v687_v51 = vpop.f32.mrb[3].mxu0  ;;  %s1927_s30 = sld [smem:[#allocation23_spill]] }
 0x1a7   : > { %s758_s9 = sshll.u32 %s412_s27, 4  ;;  %v693_v50 = vadd.f32 %v1048_v49, %v944_v48  ;;  %v688_v52 = vadd.f32 %v944_v48, %v687_v51  ;;  %s1448_s20 = smov [#allocation13]   ;;  %s1832_s9 = int_to_ptr.vmem [resolvable:$true] %s758_s9 }
 0x1a8   : > { %s1358_s21 = scalar_lea.vmem %s1832_s9, 256  ;;  %s1362_s29 = sshll.u32 %s1448_s20, 4  ;;  %s1363_s29 = int_to_ptr.vmem [resolvable:$false] %s1362_s29 }
 0x1a9   : > { %701 = vst.msk [vmem:[%s412_s27 + $0x8] sm:$0xff] %vm434_vm0, %v693_v50  ;;  %700 = vst.msk [vmem:[%s412_s27] sm:$0xff] %vm434_vm0, %v688_v52  ;;  %p1359_p4 = scmp.ne.s32.totalorder %s1832_s9, %s1358_s21  ;;  %s1364_s19 = scalar_lea.vmem %s1363_s29, 512 }
 0x1aa   : > { %p1365_p11 = scmp.lt.s32.totalorder %s1832_s9, %s1363_s29  ;;  %p1366_p8 = scmp.lt.s32.totalorder %s1364_s19, %s1358_s21 }
 0x1ab   : > { %p1360_p9 = pnand %p1359_p4, %p1655_p5 }
 0x1ac   : > { %s1928_s17 = smov %s1927_s30  ;;  %s1838_s22 = scalar_lea.hbm %s1927_s30, %s1742_s25 }
 0x1ad   : > { %p1361_p0 = pneg %p1360_p9  ;;  %p1367_p13 = por %p1366_p8, %p1365_p11 }
 0x1af   : > { %p1368_p6 = pnand %p1367_p13, %p1361_p0 }
 0x1b1   : > { %1371 = shalt.err (!%p1368_p6)
}
 0x1b2   : > { %s1372_s25 = scalar_lea.hbm %s1838_s22, 256  ;;  %s1376_s15 = scalar_lea.hbm %s1928_s17, 512 }
 0x1b3   : > { %p1373_p10 = scmp.ne.s32.totalorder %s1838_s22, %s1372_s25  ;;  %p1377_p12 = scmp.lt.u32.totalorder %s1838_s22, %s1928_s17 }
 0x1b4   : > { %p1378_p1 = scmp.lt.u32.totalorder %s1376_s15, %s1372_s25  ;;  %p1380_p4 = scmp.lt.u32.totalorder %s1372_s25, %s1838_s22 }
 0x1b5   : > { %p1374_p3 = pnand %p1373_p10, %p1655_p5 }
 0x1b6   : > { %p1379_p2 = por %p1378_p1, %p1377_p12 }
 0x1b7   : > { %p1375_p7 = pneg %p1374_p3 }
 0x1b8   : > { %p1381_p9 = por %p1380_p4, %p1379_p2 }
 0x1ba   : > { %p1382_p0 = pnand %p1381_p9, %p1375_p7 }
 0x1bc   : > { %1385 = shalt.err (!%p1382_p0)
}
 0x1bd   : > { %1113 = dma.vmem_to_hbm [thread:$0]  (%p1655_p5), %s1832_s9, 256, %s1838_s22, %s1801_s26, %s1445_s0, %s1445_s0, %s1446_s24  }
 0x1be PF: > { %s1929_s13 = sld [smem:[#allocation19_spill]]  ;;  %s1930_s30 = sld [smem:[#allocation20_spill]] }
 0x1bf   : > { %p1932_p8 = scmp.ge.s32.totalorder %s1436_s12, 2 }
 0x1c4   : > { %s773_s21 = sand.u32 1, %s1929_s13   ;;  %p1931_p11 = scmp.ne.s32.totalorder %s1930_s30, 0 }
 0x1c5   : > { %s774_s20 = scalar_lea.sflag [#allocation4], %s773_s21 }
 0x1c6   : > { %p1132_p13 = pnand %p1932_p8, %p1931_p11 }
 0x1c8   : > { %1415 = dma.done.wait (!%p1132_p13), %s774_s20, 256  }
 0x1c9   : > { %1417 = vsyncadd (!%p1132_p13), %s774_s20, 4294967040  ;;  %s1933_s16 = sadd.s32 4294967294, %s1436_s12  }
 0x1ca   : > { %s782_s29 = sand.u32 1, %s1933_s16  }
 0x1cb   : > { %s783_s19 = scalar_lea.sflag [#allocation12], %s782_s29 }
 0x1cc   : > { %1419 = dma.done.wait (!%p1132_p13), %s783_s19, 512  }
 0x1cd   : > { %1421 = vsyncadd (!%p1132_p13), %s783_s19, 4294966784  ;;  %p28_p5 = scmp.ge.s32.totalorder %s1641_s18, 4   ;;  %s1934_s30 = smov %s1428_s10 }
 0x1ce   : > { %s1935_s10 = smov %s1432_s11  ;;  %s1936_s11 = smov %s1651_s14 }
 0x1cf   : > { %s1937_s12 = smov %s1641_s18  ;;  %30 = sbr.rel (!%p28_p5) target bundleno = 13 (0xd), region = 137 }
 0x1d6   :  { %797 = vsyncpa [#allocation3], 1 }
 0x1d7   :  { %799 = vsyncpa [#allocation3 + $0x1], 1 }
 0x1d8   :  { %800 = vsyncpa [#allocation6], 1 }
 0x1d9   :  { %801 = vsyncpa [#allocation9], 1 }
 0x1da   :  { %802 = vsyncpa [#allocation4], 1 }
 0x1db   :  { %804 = vsyncpa [#allocation4 + $0x1], 1 }
 0x1dc   :  { %805 = vsyncpa [#allocation12], 1 }
 0x1dd   :  { %807 = vsyncpa [#allocation12 + $0x1], 1 }

</bundles_post_ra>
